<compile_context>
chip_gen: v6e
topology: v6e:2x2x1
jax: 0.10.0
libtpu: 0.0.40
codegen_flags: <defaults>
</compile_context>

<pallas_src>
import math

import jax
import jax.numpy as jnp
from jax import lax
from jax.experimental import pallas as pl
from jax.experimental.pallas import tpu as pltpu

_LANE = 128


# --------------------------------------------------------------------------
# Planning helpers
# --------------------------------------------------------------------------
def _vmem_budget_bytes():
    """Generation-aware VMEM budget (~3/8 of physical VMEM)."""
    phys = 128 * 1024 * 1024
    try:
        info = pltpu.get_tpu_info()
        for name in ("vmem_capacity_bytes", "vmem_size_bytes", "vmem_bytes"):
            v = getattr(info, name, None)
            if v:
                phys = int(v)
                break
    except Exception:
        pass
    return (phys * 3) // 8  # ~24 MiB on v7x (64 MiB), ~48 MiB on v5e/v6e


def _plan_tiles(hw_pad, c, xb, ob, budget, allow_fuse=True, unroll_cap=32):
    """Pick (fuse?, lane tile).  hw_pad is already a multiple of 128."""
    cands = sorted(
        {t for t in (hw_pad, 16384, 8192, 4096, 2048, 1024, 512, 256, 128)
         if 0 < t <= hw_pad and hw_pad % t == 0},
        reverse=True)
    small = 4 * c * c * 4 + (1 << 16)  # w2 / wf / shift / misc

    if allow_fuse:
        slab = c * hw_pad * xb           # cached x2 slab (native dtype)
        out_sl = 2 * c * hw_pad * ob     # double-buffered resident output slab
        for t in cands:
            n_hw = hw_pad // t
            tot = slab + out_sl + 4 * c * t * xb + small
            if n_hw <= unroll_cap and tot <= int(0.85 * budget):
                return True, t

    for t in cands:
        if 2 * c * t * (2 * xb + ob) + small <= budget // 2:
            return False, t
    return False, _LANE


# --------------------------------------------------------------------------
# In-kernel helpers
# --------------------------------------------------------------------------
def _channel_conv_sigmoid(gap, w1d_ref, c, k):
    """Conv1d(1,1,k, zero pad) along channels of a (C, 1) column + sigmoid."""
    pad = k // 2
    cidx = lax.broadcasted_iota(jnp.int32, (c, 1), 0)
    conv = jnp.zeros_like(gap)
    for j in range(k):                               # k is tiny & static
        off = j - pad
        if off == 0:
            contrib = gap
        else:
            shifted = pltpu.roll(gap, shift=(-off) % c, axis=0)
            valid = (cidx + off >= 0) & (cidx + off < c)
            contrib = jnp.where(valid, shifted, 0.0)
        conv = conv + w1d_ref[j] * contrib
    return jax.nn.sigmoid(conv)                      # (C, 1)


def _fold_gate_into_w(w2, gate, c):
    """wf[o, i] = w2[o, i] * gate[i] via W @ diag(gate) (no relayout)."""
    eye = (lax.broadcasted_iota(jnp.int32, (c, c), 0) ==
           lax.broadcasted_iota(jnp.int32, (c, c), 1))
    diag = jnp.where(eye, jnp.broadcast_to(gate, (c, c)), 0.0)
    return jnp.dot(w2, diag, preferred_element_type=jnp.float32)


# --------------------------------------------------------------------------
# Kernels
# --------------------------------------------------------------------------
def _make_fused_kernel(c, hw, k, thw, n_hw):
    inv_hw = 1.0 / float(hw)

    def kernel(x1_ref, x2_ref, w1d_ref, w2_ref, shift_ref, out_ref,
               slab_ref, acc_ref):
        h = pl.program_id(1)

        @pl.when(h == 0)
        def _():
            acc_ref[...] = jnp.zeros_like(acc_ref)

        x2_t = x2_ref[...]
        s = x1_ref[...].astype(jnp.float32) + x2_t.astype(jnp.float32)
        acc_ref[...] += jnp.sum(s, axis=1, keepdims=True)
        slab_ref[h] = x2_t               # cache tile -> no 2nd HBM read of x2

        @pl.when(h == n_hw - 1)
        def _():
            gap = acc_ref[...] * inv_hw                     # (C, 1) GAP
            gate = _channel_conv_sigmoid(gap, w1d_ref, c, k)
            wf = _fold_gate_into_w(w2_ref[...], gate, c)    # (C, C) f32
            wf = wf.astype(slab_ref.dtype)                  # native MXU dtype
            shift = shift_ref[...]                          # (C, 1) f32
            for i in range(n_hw):                           # static unroll
                ot = jnp.dot(wf, slab_ref[i],
                             preferred_element_type=jnp.float32)
                ot = jnp.maximum(ot + shift, 0.0)
                out_ref[:, i * thw:(i + 1) * thw] = ot.astype(out_ref.dtype)

    return kernel


def _make_gate_kernel(c, hw, k):
    inv_hw = 1.0 / float(hw)

    def kernel(x1_ref, x2_ref, w1d_ref, gate_ref, acc_ref):
        h = pl.program_id(1)

        @pl.when(h == 0)
        def _():
            acc_ref[...] = jnp.zeros_like(acc_ref)

        s = x1_ref[...].astype(jnp.float32) + x2_ref[...].astype(jnp.float32)
        acc_ref[...] += jnp.sum(s, axis=1, keepdims=True)

        @pl.when(h == pl.num_programs(1) - 1)
        def _():
            gap = acc_ref[...] * inv_hw
            gate_ref[...] = _channel_conv_sigmoid(gap, w1d_ref, c, k)

    return kernel


def _make_apply_kernel(c):
    def kernel(x2_ref, gate_ref, w2_ref, shift_ref, out_ref, wf_ref):
        # Hoist the O(C^2) gate fold out of the inner HW loop.
        @pl.when(pl.program_id(1) == 0)
        def _():
            wf = _fold_gate_into_w(w2_ref[...], gate_ref[...], c)
            wf_ref[...] = wf.astype(wf_ref.dtype)

        o = jnp.dot(wf_ref[...], x2_ref[...],
                    preferred_element_type=jnp.float32)
        out_ref[...] = jnp.maximum(o + shift_ref[...], 0.0).astype(out_ref.dtype)

    return kernel


# --------------------------------------------------------------------------
# Wrapper
# --------------------------------------------------------------------------
def eca_forward(x1, x2, w1d, w_conv2d, bn_gamma, bn_beta, bn_mean, bn_var,
                eps=1e-5, force_two_pass=False):
    B, C, H, W = x1.shape
    HW = H * W
    HW_pad = ((HW + _LANE - 1) // _LANE) * _LANE

    x1f = x1.reshape(B, C, HW)          # keep native dtype; cast per-tile
    x2f = x2.reshape(B, C, HW)
    if HW_pad != HW:                    # lane-dense padding for odd HW
        pw = HW_pad - HW
        x1f = jnp.pad(x1f, ((0, 0), (0, 0), (0, pw)))
        x2f = jnp.pad(x2f, ((0, 0), (0, 0), (0, pw)))

    k = int(w1d.shape[0])
    xb = max(jnp.dtype(x1.dtype).itemsize, jnp.dtype(x2.dtype).itemsize)
    ob = jnp.dtype(x2.dtype).itemsize
    budget = _vmem_budget_bytes()
    fuse, thw = _plan_tiles(HW_pad, C, xb, ob, budget,
                            allow_fuse=not force_two_pass)
    n_hw = HW_pad // thw

    # Fold inference-mode BN into the 1x1-conv weight (row scale) + shift.
    # TODO(synk): training-mode BatchNorm (batch statistics) cannot be folded.
    inv_std = bn_gamma / jnp.sqrt(bn_var + eps)
    w2 = (inv_std[:, None] * w_conv2d.reshape(C, C)).astype(jnp.float32)
    shift = (bn_beta - bn_mean * inv_std).reshape(C, 1).astype(jnp.float32)
    w1d_f = w1d.astype(jnp.float32)

    cparams = pltpu.CompilerParams(
        dimension_semantics=("parallel", "arbitrary"),
        vmem_limit_bytes=int(budget))

    if fuse:
        out = pl.pallas_call(
            _make_fused_kernel(C, HW, k, thw, n_hw),
            out_shape=jax.ShapeDtypeStruct((B, C, HW_pad), x2.dtype),
            grid_spec=pltpu.PrefetchScalarGridSpec(
                num_scalar_prefetch=0,
                grid=(B, n_hw),
                in_specs=[
                    pl.BlockSpec((pl.Squeezed(), C, thw), lambda b, h: (b, 0, h)),
                    pl.BlockSpec((pl.Squeezed(), C, thw), lambda b, h: (b, 0, h)),
                    pl.BlockSpec(memory_space=pltpu.MemorySpace.SMEM),
                    pl.BlockSpec((C, C), lambda b, h: (0, 0)),
                    pl.BlockSpec((C, 1), lambda b, h: (0, 0)),
                ],
                out_specs=pl.BlockSpec((pl.Squeezed(), C, HW_pad),
                                       lambda b, h: (b, 0, 0)),
                scratch_shapes=[
                    pltpu.VMEM((n_hw, C, thw), x2.dtype),   # cached x2 slab
                    pltpu.VMEM((C, 1), jnp.float32),        # GAP accumulator
                ],
            ),
            compiler_params=cparams,
        )(x1f, x2f, w1d_f, w2, shift)
    else:
        gate = pl.pallas_call(
            _make_gate_kernel(C, HW, k),
            out_shape=jax.ShapeDtypeStruct((B, C, 1), jnp.float32),
            grid_spec=pltpu.PrefetchScalarGridSpec(
                num_scalar_prefetch=0,
                grid=(B, n_hw),
                in_specs=[
                    pl.BlockSpec((pl.Squeezed(), C, thw), lambda b, h: (b, 0, h)),
                    pl.BlockSpec((pl.Squeezed(), C, thw), lambda b, h: (b, 0, h)),
                    pl.BlockSpec(memory_space=pltpu.MemorySpace.SMEM),
                ],
                out_specs=pl.BlockSpec((pl.Squeezed(), C, 1),
                                       lambda b, h: (b, 0, 0)),
                scratch_shapes=[pltpu.VMEM((C, 1), jnp.float32)],
            ),
            compiler_params=cparams,
        )(x1f, x2f, w1d_f)

        out = pl.pallas_call(
            _make_apply_kernel(C),
            out_shape=jax.ShapeDtypeStruct((B, C, HW_pad), x2.dtype),
            grid_spec=pltpu.PrefetchScalarGridSpec(
                num_scalar_prefetch=0,
                grid=(B, n_hw),
                in_specs=[
                    pl.BlockSpec((pl.Squeezed(), C, thw), lambda b, h: (b, 0, h)),
                    pl.BlockSpec((pl.Squeezed(), C, 1), lambda b, h: (b, 0, 0)),
                    pl.BlockSpec((C, C), lambda b, h: (0, 0)),
                    pl.BlockSpec((C, 1), lambda b, h: (0, 0)),
                ],
                out_specs=pl.BlockSpec((pl.Squeezed(), C, thw),
                                       lambda b, h: (b, 0, h)),
                scratch_shapes=[pltpu.VMEM((C, C), x2.dtype)],  # hoisted wf
            ),
            compiler_params=cparams,
        )(x2f, gate, w2, shift)

    if HW_pad != HW:
        out = out[:, :, :HW]
    return out.reshape(B, C, H, W)


# --------------------------------------------------------------------------
# Pure-JAX reference (inference-mode BN), matching the PyTorch forward.
# --------------------------------------------------------------------------
def eca_reference(x1, x2, w1d, w_conv2d, bn_gamma, bn_beta, bn_mean, bn_var,
                  eps=1e-5):
    B, C, H, W = x1.shape
    y = jnp.mean(x1 + x2, axis=(2, 3))                      # (B, C) GAP
    k = w1d.shape[0]
    pad = k // 2
    yp = jnp.pad(y, ((0, 0), (pad, pad)))
    conv = jnp.zeros_like(y)
    for j in range(k):
        conv = conv + w1d[j] * yp[:, j:j + C]
    gate = jax.nn.sigmoid(conv)                              # (B, C)
    z = x2 * gate[:, :, None, None]
    w2 = w_conv2d.reshape(C, C)
    o = jnp.einsum("oc,bchw->bohw", w2, z)
    inv_std = bn_gamma / jnp.sqrt(bn_var + eps)
    o = o * inv_std[None, :, None, None] + \
        (bn_beta - bn_mean * inv_std)[None, :, None, None]
    return jnp.maximum(o, 0.0)


if __name__ == "__main__":
    B, C, H, W = 2, 8, 16, 16

    # Kernel size as computed in ECA.__init__ (gamma=2, b=1)  -> k = 3 for C=8.
    t = int(abs((math.log(C, 2) + 1) / 2))
    k = t if t % 2 else t + 1

    key = jax.random.PRNGKey(0)
    k1, k2, k3, k4, k5, k6 = jax.random.split(key, 6)

    x1 = jax.random.normal(k1, (B, C, H, W), dtype=jnp.float32)
    x2 = jax.random.normal(k2, (B, C, H, W), dtype=jnp.float32)
    w1d = jax.random.normal(k3, (k,), dtype=jnp.float32) * 0.5
    w_conv2d = jax.random.normal(k4, (C, C, 1, 1), dtype=jnp.float32) * 0.3
    bn_gamma = 1.0 + 0.1 * jax.random.normal(k5, (C,), dtype=jnp.float32)
    bn_beta = 0.1 * jax.random.normal(k6, (C,), dtype=jnp.float32)
    bn_mean = jnp.zeros((C,), dtype=jnp.float32)
    bn_var = jnp.ones((C,), dtype=jnp.float32)

    ref = eca_reference(x1, x2, w1d, w_conv2d, bn_gamma, bn_beta, bn_mean,
                        bn_var)

    # 1) Fused single-pass path (x2 cached in VMEM: 2 reads + 1 write).
    out = jax.block_until_ready(
        eca_forward(x1, x2, w1d, w_conv2d, bn_gamma, bn_beta, bn_mean, bn_var))
    assert out.shape == (B, C, H, W)
    assert jnp.allclose(out, ref, atol=1e-4, rtol=1e-4), "fused path mismatch"

    # 2) Two-pass fallback (used when the x2 slab would not fit VMEM).
    out2 = jax.block_until_ready(
        eca_forward(x1, x2, w1d, w_conv2d, bn_gamma, bn_beta, bn_mean, bn_var,
                    force_two_pass=True))
    assert jnp.allclose(out2, ref, atol=1e-4, rtol=1e-4), "two-pass mismatch"

    # 3) Non-128-divisible spatial size -> lane-padding path.
    x1p = jax.random.normal(k1, (1, C, 15, 15), dtype=jnp.float32)
    x2p = jax.random.normal(k2, (1, C, 15, 15), dtype=jnp.float32)
    refp = eca_reference(x1p, x2p, w1d, w_conv2d, bn_gamma, bn_beta, bn_mean,
                         bn_var)
    outp = jax.block_until_ready(
        eca_forward(x1p, x2p, w1d, w_conv2d, bn_gamma, bn_beta, bn_mean,
                    bn_var))
    assert jnp.allclose(outp, refp, atol=1e-4, rtol=1e-4), "padded path mismatch"

    print("KERNEL_OK")
</pallas_src>

<mosaic_0001>
module attributes {stable_mosaic.version = 11 : i64} {
  func.func @kernel(%arg0: i32, %arg1: i32, %arg2: memref<1x8x256xf32, #tpu.memory_space<vmem>>, %arg3: memref<1x8x256xf32, #tpu.memory_space<vmem>>, %arg4: memref<3xf32, #tpu.memory_space<smem>>, %arg5: memref<8x8xf32, #tpu.memory_space<vmem>>, %arg6: memref<8x1xf32, #tpu.memory_space<vmem>>, %arg7: memref<1x8x256xf32, #tpu.memory_space<vmem>>, %arg8: memref<1x8x256xf32, #tpu.memory_space<vmem>>, %arg9: memref<8x1xf32, #tpu.memory_space<vmem>>) attributes {dimension_semantics = [#tpu.dimension_semantics<parallel>, #tpu.dimension_semantics<arbitrary>], iteration_bounds = array<i64: 2, 1>, scalar_prefetch = 0 : i64, scratch_operands = 2 : i64, tpu.core_type = #tpu.core_type<tc>, window_params = [{transform_indices = @transform_0, window_bounds = array<i64: 1, 8, 256>}, {transform_indices = @transform_1, window_bounds = array<i64: 1, 8, 256>}, {transform_indices = @transform_2, window_bounds = array<i64: 3>}, {pipeline_mode = #tpu.pipeline_mode<synchronous>, transform_indices = @transform_3, window_bounds = array<i64: 8, 8>}, {pipeline_mode = #tpu.pipeline_mode<synchronous>, transform_indices = @transform_4, window_bounds = array<i64: 8, 1>}, {transform_indices = @transform_5, window_bounds = array<i64: 1, 8, 256>}]} {
    %c0_i32 = arith.constant 0 : i32
    %0 = arith.cmpi eq, %arg1, %c0_i32 : i32
    %1 = arith.extui %0 : i1 to i32
    %c0_i32_0 = arith.constant 0 : i32
    %2 = arith.cmpi ne, %1, %c0_i32_0 : i32
    scf.if %2 {
      %cst_14 = arith.constant 0.000000e+00 : f32
      %20 = vector.broadcast %cst_14 : f32 to vector<8x1xf32>
      %c0_15 = arith.constant 0 : index
      %c0_16 = arith.constant 0 : index
      %21 = vector.load %arg9[%c0_15, %c0_16] : memref<8x1xf32, #tpu.memory_space<vmem>>, vector<8x1xf32>
      tpu.vector_store %arg9[%c0_15, %c0_16], %20 {strides = array<i32>} : memref<8x1xf32, #tpu.memory_space<vmem>>, vector<8x1xf32>,
    } else {
    }
    %c0 = arith.constant 0 : index
    %c0_1 = arith.constant 0 : index
    %c0_2 = arith.constant 0 : index
    %3 = vector.load %arg3[%c0, %c0_1, %c0_2] : memref<1x8x256xf32, #tpu.memory_space<vmem>>, vector<1x8x256xf32>
    %4 = vector.shape_cast %3 : vector<1x8x256xf32> to vector<8x256xf32>
    %c0_3 = arith.constant 0 : index
    %c0_4 = arith.constant 0 : index
    %c0_5 = arith.constant 0 : index
    %5 = vector.load %arg2[%c0_3, %c0_4, %c0_5] : memref<1x8x256xf32, #tpu.memory_space<vmem>>, vector<1x8x256xf32>
    %6 = vector.shape_cast %5 : vector<1x8x256xf32> to vector<8x256xf32>
    %7 = arith.addf %6, %4 : vector<8x256xf32>
    %c0_6 = arith.constant 0 : index
    %c0_7 = arith.constant 0 : index
    %8 = vector.load %arg9[%c0_6, %c0_7] : memref<8x1xf32, #tpu.memory_space<vmem>>, vector<8x1xf32>
    %cst = arith.constant dense<0.000000e+00> : vector<8xf32>
    %9 = vector.multi_reduction <add>, %7, %cst [1] : vector<8x256xf32> to vector<8xf32>
    %10 = vector.shape_cast %9 : vector<8xf32> to vector<8x1xf32>
    %11 = arith.addf %8, %10 : vector<8x1xf32>
    %c0_8 = arith.constant 0 : index
    %c0_9 = arith.constant 0 : index
    %12 = vector.load %arg9[%c0_8, %c0_9] : memref<8x1xf32, #tpu.memory_space<vmem>>, vector<8x1xf32>
    tpu.vector_store %arg9[%c0_8, %c0_9], %11 {strides = array<i32>} : memref<8x1xf32, #tpu.memory_space<vmem>>, vector<8x1xf32>,
    %13 = arith.index_cast %arg1 : i32 to index
    %c0_10 = arith.constant 0 : index
    %c0_11 = arith.constant 0 : index
    %14 = vector.load %arg8[%13, %c0_10, %c0_11] : memref<1x8x256xf32, #tpu.memory_space<vmem>>, vector<1x8x256xf32>
    %15 = vector.shape_cast %14 : vector<1x8x256xf32> to vector<8x256xf32>
    %16 = vector.shape_cast %4 : vector<8x256xf32> to vector<1x8x256xf32>
    tpu.vector_store %arg8[%13, %c0_10, %c0_11], %16 {strides = array<i32>} : memref<1x8x256xf32, #tpu.memory_space<vmem>>, vector<1x8x256xf32>,
    %c0_i32_12 = arith.constant 0 : i32
    %17 = arith.cmpi eq, %arg1, %c0_i32_12 : i32
    %18 = arith.extui %17 : i1 to i32
    %c0_i32_13 = arith.constant 0 : i32
    %19 = arith.cmpi ne, %18, %c0_i32_13 : i32
    scf.if %19 {
      %c0_14 = arith.constant 0 : index
      %c0_15 = arith.constant 0 : index
      %20 = vector.load %arg9[%c0_14, %c0_15] : memref<8x1xf32, #tpu.memory_space<vmem>>, vector<8x1xf32>
      %cst_16 = arith.constant 3.906250e-03 : f32
      %21 = vector.broadcast %cst_16 : f32 to vector<8x1xf32>
      %22 = arith.mulf %20, %21 : vector<8x1xf32>
      %23 = tpu.iota {dimensions = array<i32: 0>} : vector<8x1xi32>
      %cst_17 = arith.constant 0.000000e+00 : f32
      %24 = vector.broadcast %cst_17 : f32 to vector<8x1xf32>
      %c1_i32 = arith.constant 1 : i32
      %25 = tpu.dynamic_rotate %22 by %c1_i32 dim 0 : vector<8x1xf32>, i32 -> vector<8x1xf32>
      %c-1_i32 = arith.constant -1 : i32
      %26 = vector.broadcast %c-1_i32 : i32 to vector<8x1xi32>
      %27 = arith.addi %23, %26 : vector<8x1xi32>
      %c0_i32_18 = arith.constant 0 : i32
      %28 = vector.broadcast %c0_i32_18 : i32 to vector<8x1xi32>
      %29 = arith.cmpi sge, %27, %28 : vector<8x1xi32>
      %c-1_i32_19 = arith.constant -1 : i32
      %30 = vector.broadcast %c-1_i32_19 : i32 to vector<8x1xi32>
      %31 = arith.addi %23, %30 : vector<8x1xi32>
      %c8_i32 = arith.constant 8 : i32
      %32 = vector.broadcast %c8_i32 : i32 to vector<8x1xi32>
      %33 = arith.cmpi slt, %31, %32 : vector<8x1xi32>
      %34 = arith.andi %29, %33 : vector<8x1xi1>
      %cst_20 = arith.constant 0.000000e+00 : f32
      %35 = vector.broadcast %cst_20 : f32 to vector<8x1xf32>
      %36 = arith.select %34, %25, %35 : vector<8x1xi1>, vector<8x1xf32>
      %c0_21 = arith.constant 0 : index
      %37 = memref.load %arg4[%c0_21] : memref<3xf32, #tpu.memory_space<smem>>
      %38 = vector.broadcast %37 : f32 to vector<8x1xf32>
      %39 = arith.mulf %38, %36 : vector<8x1xf32>
      %40 = arith.addf %24, %39 : vector<8x1xf32>
      %c1 = arith.constant 1 : index
      %41 = memref.load %arg4[%c1] : memref<3xf32, #tpu.memory_space<smem>>
      %42 = vector.broadcast %41 : f32 to vector<8x1xf32>
      %43 = arith.mulf %42, %22 : vector<8x1xf32>
      %44 = arith.addf %40, %43 : vector<8x1xf32>
      %c7_i32 = arith.constant 7 : i32
      %45 = tpu.dynamic_rotate %22 by %c7_i32 dim 0 : vector<8x1xf32>, i32 -> vector<8x1xf32>
      %c1_i32_22 = arith.constant 1 : i32
      %46 = vector.broadcast %c1_i32_22 : i32 to vector<8x1xi32>
      %47 = arith.addi %23, %46 : vector<8x1xi32>
      %c0_i32_23 = arith.constant 0 : i32
      %48 = vector.broadcast %c0_i32_23 : i32 to vector<8x1xi32>
      %49 = arith.cmpi sge, %47, %48 : vector<8x1xi32>
      %c1_i32_24 = arith.constant 1 : i32
      %50 = vector.broadcast %c1_i32_24 : i32 to vector<8x1xi32>
      %51 = arith.addi %23, %50 : vector<8x1xi32>
      %c8_i32_25 = arith.constant 8 : i32
      %52 = vector.broadcast %c8_i32_25 : i32 to vector<8x1xi32>
      %53 = arith.cmpi slt, %51, %52 : vector<8x1xi32>
      %54 = arith.andi %49, %53 : vector<8x1xi1>
      %cst_26 = arith.constant 0.000000e+00 : f32
      %55 = vector.broadcast %cst_26 : f32 to vector<8x1xf32>
      %56 = arith.select %54, %45, %55 : vector<8x1xi1>, vector<8x1xf32>
      %c2 = arith.constant 2 : index
      %57 = memref.load %arg4[%c2] : memref<3xf32, #tpu.memory_space<smem>>
      %58 = vector.broadcast %57 : f32 to vector<8x1xf32>
      %59 = arith.mulf %58, %56 : vector<8x1xf32>
      %60 = arith.addf %44, %59 : vector<8x1xf32>
      %61 = arith.negf %60 : vector<8x1xf32>
      %62 = math.exp %61 : vector<8x1xf32>
      %cst_27 = arith.constant 1.000000e+00 : f32
      %63 = vector.broadcast %cst_27 : f32 to vector<8x1xf32>
      %64 = arith.addf %63, %62 : vector<8x1xf32>
      %65 = arith.divf %63, %64 : vector<8x1xf32>
      %c0_28 = arith.constant 0 : index
      %c0_29 = arith.constant 0 : index
      %66 = vector.load %arg5[%c0_28, %c0_29] : memref<8x8xf32, #tpu.memory_space<vmem>>, vector<8x8xf32>
      %67 = tpu.iota {dimensions = array<i32: 0>} : vector<8x8xi32>
      %68 = tpu.iota {dimensions = array<i32: 1>} : vector<8x8xi32>
      %69 = arith.cmpi eq, %67, %68 : vector<8x8xi32>
      %70 = vector.shape_cast %65 : vector<8x1xf32> to vector<8x1xf32>
      %71 = vector.broadcast %70 : vector<8x1xf32> to vector<8x8xf32>
      %cst_30 = arith.constant 0.000000e+00 : f32
      %72 = vector.broadcast %cst_30 : f32 to vector<8x8xf32>
      %73 = arith.select %69, %71, %72 : vector<8x8xi1>, vector<8x8xf32>
      %cst_31 = arith.constant dense<0.000000e+00> : vector<8x8xf32>
      %74 = tpu.matmul %66, %73, %cst_31 {dimension_numbers = #tpu.dot_dimension_numbers<[1], [0], [0], [1], [0, 0, 1, 1], [], []>} : vector<8x8xf32>, vector<8x8xf32>, vector<8x8xf32> -> vector<8x8xf32>
      %c0_32 = arith.constant 0 : index
      %c0_33 = arith.constant 0 : index
      %75 = vector.load %arg6[%c0_32, %c0_33] : memref<8x1xf32, #tpu.memory_space<vmem>>, vector<8x1xf32>
      %c0_34 = arith.constant 0 : index
      %c0_35 = arith.constant 0 : index
      %c0_36 = arith.constant 0 : index
      %76 = vector.load %arg8[%c0_34, %c0_35, %c0_36] : memref<1x8x256xf32, #tpu.memory_space<vmem>>, vector<1x8x256xf32>
      %77 = vector.shape_cast %76 : vector<1x8x256xf32> to vector<8x256xf32>
      %cst_37 = arith.constant dense<0.000000e+00> : vector<8x256xf32>
      %78 = tpu.matmul %74, %77, %cst_37 {dimension_numbers = #tpu.dot_dimension_numbers<[1], [0], [0], [1], [0, 0, 1, 1], [], []>} : vector<8x8xf32>, vector<8x256xf32>, vector<8x256xf32> -> vector<8x256xf32>
      %79 = vector.broadcast %75 : vector<8x1xf32> to vector<8x256xf32>
      %80 = arith.addf %78, %79 : vector<8x256xf32>
      %cst_38 = arith.constant 0.000000e+00 : f32
      %81 = vector.broadcast %cst_38 : f32 to vector<8x256xf32>
      %82 = arith.maximumf %80, %81 : vector<8x256xf32>
      %c0_39 = arith.constant 0 : index
      %c0_40 = arith.constant 0 : index
      %c0_41 = arith.constant 0 : index
      %83 = vector.load %arg7[%c0_39, %c0_40, %c0_41] : memref<1x8x256xf32, #tpu.memory_space<vmem>>, vector<1x8x256xf32>
      %84 = vector.shape_cast %83 : vector<1x8x256xf32> to vector<8x256xf32>
      %85 = vector.shape_cast %82 : vector<8x256xf32> to vector<1x8x256xf32>
      tpu.vector_store %arg7[%c0_39, %c0_40, %c0_41], %85 {strides = array<i32>} : memref<1x8x256xf32, #tpu.memory_space<vmem>>, vector<1x8x256xf32>,
    } else {
    }
    return
  }
  func.func @transform_0(%arg0: i32, %arg1: i32) -> (i32, i32, i32) {
    %c0_i32 = arith.constant 0 : i32
    %c0_i32_0 = arith.constant 0 : i32
    return %arg0, %c0_i32, %arg1 : i32, i32, i32
  }
  func.func @transform_1(%arg0: i32, %arg1: i32) -> (i32, i32, i32) {
    %c0_i32 = arith.constant 0 : i32
    %c0_i32_0 = arith.constant 0 : i32
    return %arg0, %c0_i32, %arg1 : i32, i32, i32
  }
  func.func @transform_2(%arg0: i32, %arg1: i32) -> i32 {
    %c0_i32 = arith.constant 0 : i32
    %c0_i32_0 = arith.constant 0 : i32
    return %c0_i32 : i32
  }
  func.func @transform_3(%arg0: i32, %arg1: i32) -> (i32, i32) {
    %c0_i32 = arith.constant 0 : i32
    %c0_i32_0 = arith.constant 0 : i32
    %c0_i32_1 = arith.constant 0 : i32
    return %c0_i32, %c0_i32_0 : i32, i32
  }
  func.func @transform_4(%arg0: i32, %arg1: i32) -> (i32, i32) {
    %c0_i32 = arith.constant 0 : i32
    %c0_i32_0 = arith.constant 0 : i32
    %c0_i32_1 = arith.constant 0 : i32
    return %c0_i32, %c0_i32_0 : i32, i32
  }
  func.func @transform_5(%arg0: i32, %arg1: i32) -> (i32, i32, i32) {
    %c0_i32 = arith.constant 0 : i32
    %c0_i32_0 = arith.constant 0 : i32
    %c0_i32_1 = arith.constant 0 : i32
    return %arg0, %c0_i32, %c0_i32_0 : i32, i32, i32
  }
}

</mosaic_0001>

<bundles_post_ra>
// kernel: tpu_custom_call.1
= control target key start
LH: loop header
LB: loop body
LE: loop exit
PB: predicated region body
PF: predicated region fallthrough
CT: control target
= control target key end

     0   :  { %s1200_s0 = inlined_call_operand.hbm [shape: f32[2,8,256], index: 0, kind: input, shape index: {}]   ;;  %s1201_s1 = inlined_call_operand.hbm [shape: f32[2,8,256], index: 1, kind: input, shape index: {}]   ;;  %s1202_s2 = inlined_call_operand.vmem [shape: f32[3], index: 2, kind: input, shape index: {}]   ;;  %s1203_s3 = inlined_call_operand.vmem [shape: f32[8,8], index: 3, kind: input, shape index: {}]   ;;  %s1204_s4 = inlined_call_operand.vmem [shape: f32[8,1], index: 4, kind: input, shape index: {}]   ;;  %s1205_s5 = inlined_call_operand.hbm [shape: f32[2,8,256], index: 5, kind: output, shape index: {}]  }
   0x1   :  { %1208 = sst [smem:[#allocation17_spill]] %s1200_s0 }
   0x2   :  { %1209 = sst [smem:[#allocation18_spill]] %s1202_s2 }
   0x3   :  { %10 = vsyncpa [#allocation5], 0 }
   0x4   :  { %12 = vsyncpa [#allocation5 + $0x1], 0 }
   0x5   :  { %13 = vsyncpa [#allocation9], 0 }
   0x6   :  { %15 = vsyncpa [#allocation9 + $0x1], 0 }
   0x7   :  { %16 = vsyncpa [#allocation7], 0 }
   0x8   :  { %17 = vsyncpa [#allocation6], 0 }
   0x9   :  { %19 = vsyncpa [#allocation6 + $0x1], 0  ;;  %s1004_s18 = smov 0   ;;  %s1006_s19 = smov 0  }
   0xa   :  { %s1008_s20 = smov 0   ;;  %s1010_s21 = smov 0  }
   0xb   :  { %s1012_s22 = smov 0   ;;  %s1014_s23 = smov 0  }
   0xc LB: > { %s682_s24 = sadd.s32 4294967295, %s965_s23   ;;  %s683_s25 = sadd.s32 4294967294, %s965_s23   ;;  %s965_s23 = sphi %s1014_s23, %s25_s23   ;;  %s961_s22 = sphi %s1012_s22, %s1229_s22   ;;  %s957_s21 = sphi %s1010_s21, %s1228_s21   ;;  %s953_s20 = sphi %s1008_s20, %s1227_s20   ;;  %s949_s19 = sphi %s1006_s19, %s1226_s19   ;;  %s945_s18 = sphi %s1004_s18, %s1225_s18  }
   0xd   : > { %p59_p0 = scmp.ne.s32.totalorder %s949_s19, %s945_s18  ;;  %p1038_p1 = scmp.eq.s32.totalorder %s682_s24, 0 }
   0xe   : > { %p1042_p2 = scmp.eq.s32.totalorder %s682_s24, 1  ;;  %p180_p3 = scmp.eq.s32.totalorder %s683_s25, 1 }
   0xf   : > { %p1048_p4 = por %p1038_p1, %p59_p0  ;;  %p684_p5 = scmp.ge.s32.totalorder %s965_s23, 1 }
  0x10   : > { %p1053_p6 = por %p180_p3, %p59_p0  ;;  %p187_p7 = scmp.lt.s32.totalorder %s965_s23, 3 }
  0x11   : > { %s1212_s28 = scalar_select %p1048_p4, 1, 0 }
  0x12   : > { %s1213_s29 = scalar_select %p1053_p6, 1, 0 }
  0x13   : > { %s1214_s2 = sld [smem:[#allocation18_spill]]  ;;  %p1061_p8 = pnand %p684_p5, %p187_p7 }
  0x14   : > { %s37_s10 = sadd.s32 1, %s961_s22  ;;  %s46_s11 = sadd.s32 1, %s953_s20 }
  0x15   : > { %p729_p10 = pneg %p1061_p8  ;;  %p39_p12 = scmp.ge.s32.totalorder %s37_s10, 2 }
  0x17   : > { %p1070_p11 = pnand %p729_p10, %p1038_p1 }
  0x19   : > { %s200_s7 = sshll.u32 %s1214_s2, 4  ;;  %p808_p0 = pneg %p1070_p11  ;;  %s201_s7 = int_to_ptr.vmem [resolvable:$true] %s200_s7 }
  0x1a   : > { %s806_s12 = scalar_lea.vmem %s201_s7, 16  ;;  %p814_p7 = scmp.lt.s32.totalorder %s201_s7, %s201_s7 }
  0x1b   : > { %p807_p13 = scmp.ne.s32.totalorder %s201_s7, %s806_s12  ;;  %p815_p6 = scmp.lt.s32.totalorder %s806_s12, %s806_s12 }
  0x1d   : > { %p809_p3 = pnand %p808_p0, %p807_p13  ;;  %p816_p9 = por %p815_p6, %p814_p7 }
  0x1f   : > { %p810_p5 = pneg %p809_p3 }
  0x21   : > { %p817_p4 = pnand %p816_p9, %p810_p5 }
  0x23   : > { %820 = shalt.err (!%p817_p4)
}
  0x24   : > { %s967_s13 = smov [#allocation10]   ;;  %s1231_s10 = smov (%p39_p12, %s37_s10), 0 }
  0x25   : > { %732 = dma.vmem_to_smem (!%p1070_p11), %s201_s7, 16, %s967_s13, [#allocation7]  }
  0x26   : > { %1217 = sst [smem:[#allocation16_spill]] %s1231_s10  ;;  %p53_p10 = scmp.ne.s32.totalorder %s953_s20, %s949_s19 }
  0x27   : > { %p54_p6 = scmp.eq.s32.totalorder %s965_s23, 0  ;;  %s41_s14 = ssub.s32 %s961_s22, %s1231_s10 }
  0x28   : > { %p745_p4 = scmp.lt.s32.totalorder %s965_s23, 2  ;;  %p44_p9 = scmp.eq.s32.totalorder %s41_s14, 0 }
  0x29   : > { %p55_p13 = por %p54_p6, %p53_p10  ;;  %p1090_p0 = por %p1042_p2, %p53_p10 }
  0x2a   : > { %s1095_s16 = sand.u32 1, %s953_s20   ;;  %s709_s25 = sshll.u32 %s961_s22, 8 }
  0x2b   : > { %s1098_s17 = scalar_select %p44_p9, %s953_s20, %s46_s11  }
  0x2c   : > { %s687_s24 = sshll.u32 %s1095_s16, 4  ;;  %s1219_s0 = sld [smem:[#allocation17_spill]] }
  0x2d   : > { %s221_s9 = scalar_lea.vmem [#allocation4], %s687_s24  ;;  %p1105_p11 = pnand %p745_p4, %p55_p13 }
  0x2e   : > { %s231_s12 = sshll.u32 %s221_s9, 4  ;;  %s1112_s11 = scalar_lea.hbm %s1201_s1, %s709_s25  ;;  %s232_s12 = int_to_ptr.vmem [resolvable:$true] %s231_s12 }
  0x2f   : > { %s218_s2 = scalar_lea.sflag [#allocation5], %s1095_s16  ;;  %p823_p2 = pneg %p1105_p11 }
  0x30   : > { %s834_s10 = scalar_lea.vmem %s232_s12, 256  ;;  %s968_s30 = smov [#allocation4]  }
  0x31   : > { %p835_p12 = scmp.ne.s32.totalorder %s232_s12, %s834_s10  ;;  %s839_s6 = sshll.u32 %s968_s30, 4  ;;  %s840_s6 = int_to_ptr.vmem [resolvable:$false] %s839_s6 }
  0x32   : > { %s229_s7 = scalar_lea.hbm %s1219_s0, %s709_s25  ;;  %s841_s9 = scalar_lea.vmem %s840_s6, 512 }
  0x33   : > { %p837_p3 = pnand %p835_p12, %p823_p2  ;;  %p842_p7 = scmp.lt.s32.totalorder %s232_s12, %s840_s6 }
  0x34   : > { %p843_p10 = scmp.lt.s32.totalorder %s841_s9, %s834_s10 }
  0x35   : > { %p838_p5 = pneg %p837_p3 }
  0x36   : > { %p844_p6 = por %p843_p10, %p842_p7 }
  0x38   : > { %p845_p4 = pnand %p844_p6, %p838_p5 }
  0x3a   : > { %848 = shalt.err (!%p845_p4)
}
  0x3b   : > { %736 = dma.hbm_to_vmem [thread:$0]  (!%p1105_p11), %s229_s7, 256, %s232_s12, %s218_s2  }
  0x3c   : > { %s242_s25 = scalar_lea.vmem [#allocation8], %s687_s24  ;;  %s239_s14 = scalar_lea.sflag [#allocation9], %s1095_s16 }
  0x3d   : > { %s252_s13 = sshll.u32 %s242_s25, 4  ;;  %s969_s30 = smov [#allocation8]   ;;  %s253_s13 = int_to_ptr.vmem [resolvable:$true] %s252_s13 }
  0x3e   : > { %s862_s0 = scalar_lea.vmem %s253_s13, 256  ;;  %s867_s10 = sshll.u32 %s969_s30, 4  ;;  %s868_s10 = int_to_ptr.vmem [resolvable:$false] %s867_s10 }
  0x3f   : > { %p863_p9 = scmp.ne.s32.totalorder %s253_s13, %s862_s0  ;;  %s869_s6 = scalar_lea.vmem %s868_s10, 512 }
  0x40   : > { %p870_p3 = scmp.lt.s32.totalorder %s253_s13, %s868_s10  ;;  %p871_p5 = scmp.lt.s32.totalorder %s869_s6, %s862_s0 }
  0x41   : > { %p865_p13 = pnand %p863_p9, %p823_p2 }
  0x42   : > { %p872_p7 = por %p871_p5, %p870_p3 }
  0x43   : > { %p866_p12 = pneg %p865_p13 }
  0x45   : > { %p873_p10 = pnand %p872_p7, %p866_p12 }
  0x47   : > { %876 = shalt.err (!%p873_p10)
}
  0x48   : > { %739 = dma.hbm_to_vmem [thread:$0]  (!%p1105_p11), %s1112_s11, 256, %s253_s13, %s239_s14  }
  0x49   : > { %261 = sbr.rel (%p1061_p8) target bundleno = 812 (0x32c), region = 40  ;;  %s1132_s2 = sand.u32 (!%p1061_p8), 1, %s949_s19  }
  0x4a   : > { %s1135_s16 = sshll.u32 (!%p1061_p8), %s1132_s2, 4  ;;  %s264_s0 = scalar_lea.sflag (!%p1061_p8), [#allocation5], %s1132_s2 }
  0x4b   : > { %s267_s24 = scalar_lea.vmem (!%p1061_p8), [#allocation4], %s1135_s16  ;;  %p1221_p2 = scmp.ne.s32.totalorder (!%p1061_p8), %s1212_s28, 0 }
  0x4e   : > { %928 = dma.done.wait (%p1221_p2), %s264_s0, 256  }
  0x4f   : > { %930 = vsyncadd (%p1221_p2), %s264_s0, 4294967040  ;;  %s273_s8 = scalar_lea.sflag [#allocation9], %s1132_s2  ;;  %s276_s7 = scalar_lea.vmem [#allocation8], %s1135_s16 }
  0x50   : > { %932 = dma.done.wait (%p1221_p2), %s273_s8, 256  }
  0x51   : > { %934 = vsyncadd (%p1221_p2), %s273_s8, 4294967040 }
  0x52   : > { %936 = dma.done.wait (%p1038_p1), [#allocation7], 16  }
  0x53   : > { %938 = vsyncadd (%p1038_p1), [#allocation7], 4294967280 }
  0x54   : > { %285 = sfence }
  0x55   : > { %v321_v0 = vld [vmem:[%s276_s7] sm:$0xff]  ;;  %v322_v1 = vld [vmem:[%s276_s7 + $0x8] sm:$0xff]  ;;  %vm319_vm0 = vcmask 7168   ;;  %v970_v7 = vmov 0.0   ;;  %v971_v8 = vmov 0   ;;  %v344_v11 = vlaneseq  ;;  %s698_s26 = sld [smem:[#allocation10 + $0x1]] }
  0x56   : > { %v323_v2 = vld [vmem:[%s267_s24] sm:$0xff]  ;;  %v324_v3 = vld [vmem:[%s267_s24 + $0x8] sm:$0xff]  ;;  %501 = vmatprep.subr.mxu1 %v322_v1  ;;  %320 = vst.msk [vmem:[#allocation3] sm:$0xff] %vm319_vm0, %v970_v7  ;;  %714 = vmatprep.subr.mxu0 %v970_v7  ;;  %s352_s28 = sld [smem:[#allocation10]]  ;;  %vm972_vm3 = vmmov 0   ;;  %vm386_vm5 = vcmask 64512  }
  0x57   : > { %v325_v4 = vadd.f32 %v323_v2, %v321_v0  ;;  %v326_v5 = vadd.f32 %v324_v3, %v322_v1  ;;  %502 = vmatpush1.msra.mxu1 %v321_v0  ;;  %535 = vmatprep.mubr.f32.mxu1 %v970_v7  ;;  %v345_v13 = vshrl.u32 %v344_v11, 7  ;;  %s699_s12 = sld [smem:[#allocation10 + $0x2]]  ;;  %v378_v34 = vand.u32 127, %v344_v11  ;;  %v376_v35 = vld [vmem:[%s1203_s3] sm:$0xff]  ;;  %s711_s13 = sshll.u32 %s957_s21, 8 }
  0x58   : > { %800 = vset.pattern.permute.xlu0 %v971_v8  ;;  %801 = vset.pattern.permute.xlu1 %v971_v8  ;;  %v460_v37 = vld [vmem:[%s1204_s4] sm:$0xff]  ;;  %s312_s14 = scalar_lea.vmem [#allocation11], %s1135_s16  ;;  %s559_s0 = scalar_lea.hbm %s1205_s5, %s711_s13 }
  0x59   : > { %v328_v6 = vadd.f32 %v326_v5, %v325_v4  ;;  %v347_v14 = vadd.s32 4294967295, %v345_v13  ;;  %v361_v15 = vadd.s32 1, %v345_v13  ;;  %716 = vmatprep.mubr.msk.f32.mxu0 %vm972_vm3, %v970_v7  ;;  %vm379_vm4 = vcmp.eq.s32.totalorder %v345_v13, %v378_v34  ;;  %465 = vperm.xlu1 %801, %v460_v37   ;;  %s561_s30 = sshll.u32 %s312_s14, 4  ;;  %s547_s24 = scalar_lea.sflag [#allocation6], %s1132_s2  ;;  %s562_s30 = int_to_ptr.vmem [resolvable:$true] %s561_s30 }
  0x5a   : > { %s877_s8 = scalar_lea.vmem %s562_s30, 256  ;;  %s973_s7 = smov [#allocation11]  }
  0x5b   : > { %329 = vadd.xlane.f32.xlu0 %v328_v6  ;;  %vm348_vm1 = vcmp.ge.s32.totalorder %v347_v14, 0  ;;  %vm363_vm2 = vcmp.lt.s32.totalorder %v361_v15, 8  ;;  %v357_v20 = vstv %s698_s26  ;;  %p878_p1 = scmp.ne.s32.totalorder %s562_s30, %s877_s8  ;;  %s881_s21 = sshll.u32 %s973_s7, 4  ;;  %s882_s21 = int_to_ptr.vmem [resolvable:$false] %s881_s21 }
  0x5c   : > { %v353_v19 = vstv %s352_s28  ;;  %s883_s16 = scalar_lea.vmem %s882_s21, 512  ;;  %p884_p6 = scmp.lt.s32.totalorder %s562_s30, %s882_s21 }
  0x5d   : > { %v327_v9 = vld [vmem:[#allocation3] sm:$0xff]  ;;  %v367_v24 = vstv %s699_s12  ;;  %p879_p8 = pnand %p878_p1, %p1090_p0  ;;  %p885_p4 = scmp.lt.s32.totalorder %s883_s16, %s877_s8 }
  0x5f   : > { %p880_p11 = pneg %p879_p8  ;;  %p886_p9 = por %p885_p4, %p884_p6 }
  0x61   : > { %p887_p13 = pnand %p886_p9, %p880_p11 }
  0xd4   : > { %v466_v40 = vpop.permute.xlu1 %465 }
  0xe4   : > { %v330_v10 = vpop.xlane.xlu0 %329 }
  0xe5   : > { %v331_v12 = vadd.f32 %v330_v10, %v327_v9 }
  0xe7   : > { %333 = vst.msk [vmem:[#allocation3] sm:$0xff] %vm319_vm0, %v331_v12 }
  0xee   : > { %v342_v16 = vld [vmem:[#allocation3] sm:$0xff] }
  0xef   : > { %v343_v17 = vmul.f32 0.00390625, %v342_v16 }
  0xf1   : > { %v346_v18 = vrot.slane %v343_v17, 7  ;;  %v360_v21 = vrot.slane %v343_v17, 1  ;;  %v358_v26 = vmul.f32 %v357_v20, %v343_v17 }
  0xf3   : > { %v351_v22 = vsel %vm348_vm1, %v346_v18, 0.0  ;;  %v365_v23 = vsel %vm363_vm2, %v360_v21, 0.0 }
  0xf4   : > { %v354_v25 = vmul.f32 %v353_v19, %v351_v22  ;;  %v368_v28 = vmul.f32 %v367_v24, %v365_v23 }
  0xf6   : > { %v359_v27 = vadd.f32 %v358_v26, %v354_v25 }
  0xf8   : > { %v369_v29 = vadd.f32 %v368_v28, %v359_v27 }
  0xfa   : > { %v700_v30 = vmul.f32 -1.442695, %v369_v29 }
  0xfc   : > { %802 = vpow2.f32 %v700_v30 }
 0x109   : > { %v803_v31 = vpop.eup %802 }
 0x10a   : > { %v373_v32 = vadd.f32 1.0, %v803_v31 }
 0x10c   : > { %804 = vrcp.f32 %v373_v32 }
 0x119   : > { %v805_v33 = vpop.eup %804 }
 0x11a   : > { %382 = vperm.xlu0 %800, %v805_v33  }
 0x195   : > { %v383_v36 = vpop.permute.xlu0 %382 }
 0x196   : > { %715 = vmatpush3.msk.msra.mxu0 %vm379_vm4, %v383_v36 }
 0x197   : > { %717 = vmatmul.mubr.msk.f32.vlgmr.msra.gmra.mxu0 %vm386_vm5, %v376_v35 }
 0x257   : > { %v456_v38 = vpop.f32.mrf.mxu0 }
 0x258   : > { %703 = vmatmul.mubr.msk.f32.vlgmr.msra.gmra.mxu1 %vm386_vm5, %v456_v38 }
 0x259   : > { %v718_v39 = vpop.f32.mrf.mxu0 }
 0x318   : > { %v537_v41 = vpop.f32.mrf.mxu1 }
 0x319   : > { %v538_v42 = vadd.f32 %v537_v41, %v466_v40 }
 0x31a   : > { %v539_v43 = vpop.f32.mrf.mxu1 }
 0x31b   : > { %v542_v44 = vmax.f32 %v538_v42, 0.0  ;;  %v540_v45 = vadd.f32 %v539_v43, %v466_v40 }
 0x31d   : > { %544 = vst [vmem:[%s312_s14] sm:$0xff] %v542_v44  ;;  %v543_v46 = vmax.f32 %v540_v45, 0.0 }
 0x31f   : > { %545 = vst [vmem:[%s312_s14 + $0x8] sm:$0xff] %v543_v46 }
 0x320   : > { %890 = shalt.err (!%p887_p13)
}
 0x321   : > { %s891_s26 = scalar_lea.hbm %s559_s0, 256  ;;  %s895_s12 = scalar_lea.hbm %s1205_s5, 512 }
 0x322   : > { %p892_p12 = scmp.ne.s32.totalorder %s559_s0, %s891_s26  ;;  %p896_p7 = scmp.lt.s32.totalorder %s559_s0, %s1205_s5 }
 0x323   : > { %p897_p10 = scmp.lt.s32.totalorder %s895_s12, %s891_s26 }
 0x324   : > { %p893_p3 = pnand %p892_p12, %p1090_p0 }
 0x325   : > { %p898_p2 = por %p897_p10, %p896_p7 }
 0x326   : > { %p894_p5 = pneg %p893_p3 }
 0x328   : > { %p899_p1 = pnand %p898_p2, %p894_p5 }
 0x32a   : > { %902 = shalt.err (!%p899_p1)
}
 0x32b   : > { %727 = dma.vmem_to_hbm [thread:$0]  (%p1090_p0), %s562_s30, 256, %s559_s0, %s547_s24  }
 0x32c PF: > { %s573_s9 = sand.u32 1, %s945_s18   ;;  %p1222_p8 = scmp.ne.s32.totalorder %s1213_s29, 0 }
 0x32d   : > { %p1223_p11 = scmp.ge.s32.totalorder %s965_s23, 2  ;;  %s574_s25 = scalar_lea.sflag [#allocation6], %s573_s9 }
 0x32f   : > { %p741_p6 = pnand %p1223_p11, %p1222_p8 }
 0x331   : > { %p742_p4 = pneg %p741_p6 }
 0x333   : > { %940 = dma.done.wait (%p742_p4), %s574_s25, 256  }
 0x334   : > { %942 = vsyncadd (%p742_p4), %s574_s25, 4294967040  ;;  %s25_s23 = sadd.s32 1, %s965_s23   ;;  %s1224_s15 = sld [smem:[#allocation16_spill]] }
 0x335   : > { %p22_p9 = scmp.ge.s32.totalorder %s25_s23, 4   ;;  %s1225_s18 = smov %s949_s19 }
 0x336   : > { %s1226_s19 = smov %s953_s20  ;;  %s1227_s20 = smov %s1098_s17 }
 0x337   : > { %s1228_s21 = smov %s961_s22  ;;  %24 = sbr.rel (!%p22_p9) target bundleno = 12 (0xc), region = 112 }
 0x33a   : > { %s1229_s22 = smov %s1224_s15 }
 0x33c   :  { %579 = vsyncpa [#allocation5], 1 }
 0x33d   :  { %581 = vsyncpa [#allocation5 + $0x1], 1 }
 0x33e   :  { %582 = vsyncpa [#allocation9], 1 }
 0x33f   :  { %584 = vsyncpa [#allocation9 + $0x1], 1 }
 0x340   :  { %585 = vsyncpa [#allocation6], 1 }
 0x341   :  { %587 = vsyncpa [#allocation6 + $0x1], 1 }
 0x342   :  { %588 = vsyncpa [#allocation7], 1 }
 0x343   :  { %590 = vsyncpa [#allocation7 + $0x1], 1 }

</bundles_post_ra>
